<compile_context>
chip_gen: v6e
topology: v6e:2x2x1
jax: 0.10.0
libtpu: 0.0.40
codegen_flags: <defaults>
</compile_context>

<pallas_src>
import functools

import jax
import jax.numpy as jnp
from jax.experimental import pallas as pl
from jax.experimental.pallas import tpu as pltpu


def _round_up(x: int, m: int) -> int:
    return ((x + m - 1) // m) * m


def _mlp_fused_kernel(x_ref, *refs, num_hidden: int):
    """Fused forward for one batch tile.

    refs = (w0, b0, w1, b1, ..., w_out, b_out, o_ref).
    Weights: bf16 (padded to 128 lanes).  Biases: f32 (1, N_pad).
    All matmuls accumulate in f32 on the MXU; activations stay on-chip in
    bf16 between layers (no HBM round-trips anywhere in the chain).
    """
    o_ref = refs[-1]
    h = x_ref[...].astype(jnp.bfloat16)
    for i in range(num_hidden):
        w = refs[2 * i][...]                  # (K_pad, N_pad) bf16
        b = refs[2 * i + 1][...]              # (1, N_pad) f32, broadcasts over rows
        acc = jnp.dot(h, w, preferred_element_type=jnp.float32) + b
        h = jnp.maximum(acc, 0.0).astype(jnp.bfloat16)
    w_out = refs[2 * num_hidden][...]
    b_out = refs[2 * num_hidden + 1][...]
    y = jnp.tanh(jnp.dot(h, w_out, preferred_element_type=jnp.float32) + b_out)
    o_ref[...] = y.astype(o_ref.dtype)


def init_mlp_params(key, input_dims, hid_dims, out_dims):
    """Parameter init mirroring MLP(kaiming_init=True).

    Hidden weights: kaiming-uniform; out weight: xavier-uniform; biases: zero.
    Weights are stored [in_features, out_features] (transposed from PyTorch).
    """
    dims = [input_dims] + list(hid_dims)
    hidden = []
    for i in range(len(dims) - 1):
        fan_in, fan_out = dims[i], dims[i + 1]
        key, sub = jax.random.split(key)
        bound = jnp.sqrt(6.0 / fan_in)                    # kaiming_uniform_, a=0
        w = jax.random.uniform(sub, (fan_in, fan_out), jnp.float32, -bound, bound)
        hidden.append((w, jnp.zeros((fan_out,), jnp.float32)))
    fan_in, fan_out = dims[-1], out_dims
    key, sub = jax.random.split(key)
    bound = jnp.sqrt(6.0 / (fan_in + fan_out))            # xavier_uniform_
    w_out = jax.random.uniform(sub, (fan_in, fan_out), jnp.float32, -bound, bound)
    return hidden, (w_out, jnp.zeros((fan_out,), jnp.float32))


def pack_mlp_params(hidden_params, out_params):
    """One-time packing: bf16-cast and zero-pad every weight to 128-lane
    alignment; biases stay f32 (added to the f32 accumulator).

    Zero padding keeps the math exact: extra K rows contribute 0 to the dot,
    extra N columns produce 0 activations (ReLU(0)=0) that feed zero weight
    rows of the next layer.
    """
    packed = []
    for w, b in list(hidden_params) + [out_params]:
        k_in, n_out = w.shape
        k_pad, n_pad = _round_up(k_in, 128), _round_up(n_out, 128)
        w_pad = (jnp.zeros((k_pad, n_pad), jnp.bfloat16)
                 .at[:k_in, :n_out].set(w.astype(jnp.bfloat16)))
        b_pad = jnp.zeros((1, n_pad), jnp.float32).at[0, :n_out].set(b)
        packed.append((w_pad, b_pad))
    return packed


def _choose_batch_tile(B: int) -> int:
    """Batch tile heuristic.

    Constraints / goals:
      * multiple of 16 (bf16 sublane packing for the bf16 activation chain),
      * capped at 256 rows (v6e/v7x MXU native tile; v5e is fine too),
      * minimal padded total (avoid an almost-all-padding tail tile),
      * >= 2 grid steps when possible so the 'parallel' batch axis can shard
        across v7x's 2 TensorCores (cheap on v5e/v6e: one extra ~0.35us step).
    """
    tb_max = min(256, _round_up(B, 16))
    best_tb, best_pad = 16, _round_up(B, 16)
    for tb in range(16, tb_max + 1, 16):
        pad = _round_up(B, tb)
        if pad < best_pad or (pad == best_pad and tb > best_tb):
            best_tb, best_pad = tb, pad
    tb = best_tb
    if _round_up(B, tb) == tb and tb >= 32:     # would be a 1-step grid
        half = _round_up(tb // 2, 16)
        if half < tb:
            tb = half
    return tb


def mlp_forward(x, packed_params, out_dims):
    """x: [B, input_dims] f32 -> [B, out_dims] f32, single fused pallas_call."""
    B, K = x.shape
    k_pad = packed_params[0][0].shape[0]
    out_pad = packed_params[-1][0].shape[1]
    num_hidden = len(packed_params) - 1

    tb = _choose_batch_tile(B)
    b_pad = _round_up(B, tb)

    # Skip the pad copy entirely when shapes are already aligned.
    if b_pad == B and k_pad == K:
        x_pad = x
    else:
        x_pad = jnp.zeros((b_pad, k_pad), x.dtype).at[:B, :K].set(x)

    flat_params = []
    for w, b in packed_params:
        flat_params += [w, b]

    kernel = functools.partial(_mlp_fused_kernel, num_hidden=num_hidden)

    # VMEM budget: resident params (single-buffered), double-buffered x/out
    # tiles, plus f32 activation headroom; 2x safety margin, clamped to
    # [32 MiB, 64 MiB] (v7x physical VMEM is 64 MiB per TC).
    param_bytes = sum(p.size * p.dtype.itemsize for p in flat_params)
    max_np = max(w.shape[1] for w, _ in packed_params)
    io_bytes = 2 * tb * k_pad * 4 + 2 * tb * out_pad * 4
    act_bytes = 2 * tb * max_np * 4
    vmem_limit = int(min(max(2 * (param_bytes + io_bytes + act_bytes), 32 << 20),
                         64 << 20))

    def build_specs(single_buffer_weights):
        in_specs = [pl.BlockSpec((tb, k_pad), lambda i: (i, 0))]
        for w, b in packed_params:
            kp, np_ = w.shape
            if single_buffer_weights:
                # Constant index_map => never re-fetched across grid steps;
                # single-buffer to avoid 2x VMEM for resident weights.
                in_specs.append(pl.BlockSpec((kp, np_), lambda i: (0, 0),
                                             pipeline_mode=pl.Buffered(1)))
                in_specs.append(pl.BlockSpec((1, np_), lambda i: (0, 0),
                                             pipeline_mode=pl.Buffered(1)))
            else:
                in_specs.append(pl.BlockSpec((kp, np_), lambda i: (0, 0)))
                in_specs.append(pl.BlockSpec((1, np_), lambda i: (0, 0)))
        return in_specs

    def call(single_buffer_weights):
        return pl.pallas_call(
            kernel,
            out_shape=jax.ShapeDtypeStruct((b_pad, out_pad), x.dtype),
            grid=(b_pad // tb,),
            in_specs=build_specs(single_buffer_weights),
            out_specs=pl.BlockSpec((tb, out_pad), lambda i: (i, 0)),
            compiler_params=pltpu.CompilerParams(
                dimension_semantics=("parallel",),
                vmem_limit_bytes=vmem_limit),
        )(x_pad, *flat_params)

    try:
        y_pad = call(single_buffer_weights=True)
    except Exception:
        # Fallback in case Buffered(1) is rejected by this Pallas version;
        # identical math, default double-buffered weights.
        y_pad = call(single_buffer_weights=False)

    if b_pad == B and out_pad == out_dims:
        return y_pad
    return y_pad[:B, :out_dims]


if __name__ == "__main__":
    key = jax.random.PRNGKey(0)
    batch = 8
    input_dims = 32
    hid_dims = [64, 64]
    out_dims = 16

    key, xkey = jax.random.split(key)
    x = jax.random.normal(xkey, (batch, input_dims), jnp.float32)

    hidden_params, out_params = init_mlp_params(key, input_dims, hid_dims, out_dims)
    packed = pack_mlp_params(hidden_params, out_params)   # one-time pad + bf16 cast

    y = mlp_forward(x, packed, out_dims)
    jax.block_until_ready(y)

    # Pure-JAX f32 reference (unpadded params). Kernel uses bf16 operands with
    # f32 accumulation, so the tolerance is the bf16 budget (~1e-2).
    h = x
    for w, b in hidden_params:
        h = jnp.maximum(h @ w + b, 0.0)
    w_out, b_out = out_params
    ref = jnp.tanh(h @ w_out + b_out)
    assert y.shape == ref.shape, "shape mismatch vs reference"
    assert jnp.allclose(y, ref, atol=5e-2, rtol=5e-2), "mismatch vs reference"

    print("KERNEL_OK")
</pallas_src>

<mosaic_0001>
module attributes {stable_mosaic.version = 11 : i64} {
  func.func @_mlp_fused_kernel(%arg0: i32, %arg1: memref<16x128xf32, #tpu.memory_space<vmem>>, %arg2: memref<128x128xbf16, #tpu.memory_space<vmem>>, %arg3: memref<1x128xf32, #tpu.memory_space<vmem>>, %arg4: memref<128x128xbf16, #tpu.memory_space<vmem>>, %arg5: memref<1x128xf32, #tpu.memory_space<vmem>>, %arg6: memref<128x128xbf16, #tpu.memory_space<vmem>>, %arg7: memref<1x128xf32, #tpu.memory_space<vmem>>, %arg8: memref<16x128xf32, #tpu.memory_space<vmem>>) attributes {dimension_semantics = [#tpu.dimension_semantics<parallel>], iteration_bounds = array<i64: 1>, scalar_prefetch = 0 : i64, scratch_operands = 0 : i64, tpu.core_type = #tpu.core_type<tc>, window_params = [{transform_indices = @transform_0, window_bounds = array<i64: 16, 128>}, {pipeline_mode = #tpu.pipeline_mode<synchronous>, transform_indices = @transform_1, window_bounds = array<i64: 128, 128>}, {pipeline_mode = #tpu.pipeline_mode<synchronous>, transform_indices = @transform_2, window_bounds = array<i64: 1, 128>}, {pipeline_mode = #tpu.pipeline_mode<synchronous>, transform_indices = @transform_3, window_bounds = array<i64: 128, 128>}, {pipeline_mode = #tpu.pipeline_mode<synchronous>, transform_indices = @transform_4, window_bounds = array<i64: 1, 128>}, {pipeline_mode = #tpu.pipeline_mode<synchronous>, transform_indices = @transform_5, window_bounds = array<i64: 128, 128>}, {pipeline_mode = #tpu.pipeline_mode<synchronous>, transform_indices = @transform_6, window_bounds = array<i64: 1, 128>}, {transform_indices = @transform_7, window_bounds = array<i64: 16, 128>}]} {
    %c0 = arith.constant 0 : index
    %c0_0 = arith.constant 0 : index
    %0 = vector.load %arg1[%c0, %c0_0] : memref<16x128xf32, #tpu.memory_space<vmem>>, vector<16x128xf32>
    %1 = arith.truncf %0 : vector<16x128xf32> to vector<16x128xbf16>
    %c0_1 = arith.constant 0 : index
    %c0_2 = arith.constant 0 : index
    %2 = vector.load %arg2[%c0_1, %c0_2] : memref<128x128xbf16, #tpu.memory_space<vmem>>, vector<128x128xbf16>
    %c0_3 = arith.constant 0 : index
    %c0_4 = arith.constant 0 : index
    %3 = vector.load %arg3[%c0_3, %c0_4] : memref<1x128xf32, #tpu.memory_space<vmem>>, vector<1x128xf32>
    %cst = arith.constant dense<0.000000e+00> : vector<16x128xf32>
    %4 = tpu.matmul %1, %2, %cst {dimension_numbers = #tpu.dot_dimension_numbers<[1], [0], [0], [1], [0, 0, 1, 1], [], []>} : vector<16x128xbf16>, vector<128x128xbf16>, vector<16x128xf32> -> vector<16x128xf32>
    %5 = vector.broadcast %3 : vector<1x128xf32> to vector<16x128xf32>
    %6 = arith.addf %4, %5 : vector<16x128xf32>
    %cst_5 = arith.constant 0.000000e+00 : f32
    %7 = vector.broadcast %cst_5 : f32 to vector<16x128xf32>
    %8 = arith.maximumf %6, %7 : vector<16x128xf32>
    %9 = arith.truncf %8 : vector<16x128xf32> to vector<16x128xbf16>
    %c0_6 = arith.constant 0 : index
    %c0_7 = arith.constant 0 : index
    %10 = vector.load %arg4[%c0_6, %c0_7] : memref<128x128xbf16, #tpu.memory_space<vmem>>, vector<128x128xbf16>
    %c0_8 = arith.constant 0 : index
    %c0_9 = arith.constant 0 : index
    %11 = vector.load %arg5[%c0_8, %c0_9] : memref<1x128xf32, #tpu.memory_space<vmem>>, vector<1x128xf32>
    %cst_10 = arith.constant dense<0.000000e+00> : vector<16x128xf32>
    %12 = tpu.matmul %9, %10, %cst_10 {dimension_numbers = #tpu.dot_dimension_numbers<[1], [0], [0], [1], [0, 0, 1, 1], [], []>} : vector<16x128xbf16>, vector<128x128xbf16>, vector<16x128xf32> -> vector<16x128xf32>
    %13 = vector.broadcast %11 : vector<1x128xf32> to vector<16x128xf32>
    %14 = arith.addf %12, %13 : vector<16x128xf32>
    %cst_11 = arith.constant 0.000000e+00 : f32
    %15 = vector.broadcast %cst_11 : f32 to vector<16x128xf32>
    %16 = arith.maximumf %14, %15 : vector<16x128xf32>
    %17 = arith.truncf %16 : vector<16x128xf32> to vector<16x128xbf16>
    %c0_12 = arith.constant 0 : index
    %c0_13 = arith.constant 0 : index
    %18 = vector.load %arg6[%c0_12, %c0_13] : memref<128x128xbf16, #tpu.memory_space<vmem>>, vector<128x128xbf16>
    %c0_14 = arith.constant 0 : index
    %c0_15 = arith.constant 0 : index
    %19 = vector.load %arg7[%c0_14, %c0_15] : memref<1x128xf32, #tpu.memory_space<vmem>>, vector<1x128xf32>
    %cst_16 = arith.constant dense<0.000000e+00> : vector<16x128xf32>
    %20 = tpu.matmul %17, %18, %cst_16 {dimension_numbers = #tpu.dot_dimension_numbers<[1], [0], [0], [1], [0, 0, 1, 1], [], []>} : vector<16x128xbf16>, vector<128x128xbf16>, vector<16x128xf32> -> vector<16x128xf32>
    %21 = vector.broadcast %19 : vector<1x128xf32> to vector<16x128xf32>
    %22 = arith.addf %20, %21 : vector<16x128xf32>
    %23 = math.tanh %22 : vector<16x128xf32>
    %c0_17 = arith.constant 0 : index
    %c0_18 = arith.constant 0 : index
    %24 = vector.load %arg8[%c0_17, %c0_18] : memref<16x128xf32, #tpu.memory_space<vmem>>, vector<16x128xf32>
    tpu.vector_store %arg8[%c0_17, %c0_18], %23 {strides = array<i32>} : memref<16x128xf32, #tpu.memory_space<vmem>>, vector<16x128xf32>,
    return
  }
  func.func @transform_0(%arg0: i32) -> (i32, i32) {
    %c0_i32 = arith.constant 0 : i32
    %c0_i32_0 = arith.constant 0 : i32
    return %arg0, %c0_i32 : i32, i32
  }
  func.func @transform_1(%arg0: i32) -> (i32, i32) {
    %c0_i32 = arith.constant 0 : i32
    %c0_i32_0 = arith.constant 0 : i32
    %c0_i32_1 = arith.constant 0 : i32
    return %c0_i32, %c0_i32_0 : i32, i32
  }
  func.func @transform_2(%arg0: i32) -> (i32, i32) {
    %c0_i32 = arith.constant 0 : i32
    %c0_i32_0 = arith.constant 0 : i32
    %c0_i32_1 = arith.constant 0 : i32
    return %c0_i32, %c0_i32_0 : i32, i32
  }
  func.func @transform_3(%arg0: i32) -> (i32, i32) {
    %c0_i32 = arith.constant 0 : i32
    %c0_i32_0 = arith.constant 0 : i32
    %c0_i32_1 = arith.constant 0 : i32
    return %c0_i32, %c0_i32_0 : i32, i32
  }
  func.func @transform_4(%arg0: i32) -> (i32, i32) {
    %c0_i32 = arith.constant 0 : i32
    %c0_i32_0 = arith.constant 0 : i32
    %c0_i32_1 = arith.constant 0 : i32
    return %c0_i32, %c0_i32_0 : i32, i32
  }
  func.func @transform_5(%arg0: i32) -> (i32, i32) {
    %c0_i32 = arith.constant 0 : i32
    %c0_i32_0 = arith.constant 0 : i32
    %c0_i32_1 = arith.constant 0 : i32
    return %c0_i32, %c0_i32_0 : i32, i32
  }
  func.func @transform_6(%arg0: i32) -> (i32, i32) {
    %c0_i32 = arith.constant 0 : i32
    %c0_i32_0 = arith.constant 0 : i32
    %c0_i32_1 = arith.constant 0 : i32
    return %c0_i32, %c0_i32_0 : i32, i32
  }
  func.func @transform_7(%arg0: i32) -> (i32, i32) {
    %c0_i32 = arith.constant 0 : i32
    %c0_i32_0 = arith.constant 0 : i32
    return %arg0, %c0_i32 : i32, i32
  }
}

module attributes {stable_mosaic.version = 11 : i64} {
  func.func @_mlp_fused_kernel(%arg0: i32, %arg1: memref<16x128xf32, #tpu.memory_space<vmem>>, %arg2: memref<128x128xbf16, #tpu.memory_space<vmem>>, %arg3: memref<1x128xf32, #tpu.memory_space<vmem>>, %arg4: memref<128x128xbf16, #tpu.memory_space<vmem>>, %arg5: memref<1x128xf32, #tpu.memory_space<vmem>>, %arg6: memref<128x128xbf16, #tpu.memory_space<vmem>>, %arg7: memref<1x128xf32, #tpu.memory_space<vmem>>, %arg8: memref<16x128xf32, #tpu.memory_space<vmem>>) attributes {dimension_semantics = [#tpu.dimension_semantics<parallel>], iteration_bounds = array<i64: 1>, scalar_prefetch = 0 : i64, scratch_operands = 0 : i64, tpu.core_type = #tpu.core_type<tc>, window_params = [{transform_indices = @transform_0, window_bounds = array<i64: 16, 128>}, {pipeline_mode = #tpu.pipeline_mode<synchronous>, transform_indices = @transform_1, window_bounds = array<i64: 128, 128>}, {pipeline_mode = #tpu.pipeline_mode<synchronous>, transform_indices = @transform_2, window_bounds = array<i64: 1, 128>}, {pipeline_mode = #tpu.pipeline_mode<synchronous>, transform_indices = @transform_3, window_bounds = array<i64: 128, 128>}, {pipeline_mode = #tpu.pipeline_mode<synchronous>, transform_indices = @transform_4, window_bounds = array<i64: 1, 128>}, {pipeline_mode = #tpu.pipeline_mode<synchronous>, transform_indices = @transform_5, window_bounds = array<i64: 128, 128>}, {pipeline_mode = #tpu.pipeline_mode<synchronous>, transform_indices = @transform_6, window_bounds = array<i64: 1, 128>}, {transform_indices = @transform_7, window_bounds = array<i64: 16, 128>}]} {
    %c0 = arith.constant 0 : index
    %c0_0 = arith.constant 0 : index
    %0 = vector.load %arg1[%c0, %c0_0] : memref<16x128xf32, #tpu.memory_space<vmem>>, vector<16x128xf32>
    %1 = arith.truncf %0 : vector<16x128xf32> to vector<16x128xbf16>
    %c0_1 = arith.constant 0 : index
    %c0_2 = arith.constant 0 : index
    %2 = vector.load %arg2[%c0_1, %c0_2] : memref<128x128xbf16, #tpu.memory_space<vmem>>, vector<128x128xbf16>
    %c0_3 = arith.constant 0 : index
    %c0_4 = arith.constant 0 : index
    %3 = vector.load %arg3[%c0_3, %c0_4] : memref<1x128xf32, #tpu.memory_space<vmem>>, vector<1x128xf32>
    %cst = arith.constant dense<0.000000e+00> : vector<16x128xf32>
    %4 = tpu.matmul %1, %2, %cst {dimension_numbers = #tpu.dot_dimension_numbers<[1], [0], [0], [1], [0, 0, 1, 1], [], []>} : vector<16x128xbf16>, vector<128x128xbf16>, vector<16x128xf32> -> vector<16x128xf32>
    %5 = vector.broadcast %3 : vector<1x128xf32> to vector<16x128xf32>
    %6 = arith.addf %4, %5 : vector<16x128xf32>
    %cst_5 = arith.constant 0.000000e+00 : f32
    %7 = vector.broadcast %cst_5 : f32 to vector<16x128xf32>
    %8 = arith.maximumf %6, %7 : vector<16x128xf32>
    %9 = arith.truncf %8 : vector<16x128xf32> to vector<16x128xbf16>
    %c0_6 = arith.constant 0 : index
    %c0_7 = arith.constant 0 : index
    %10 = vector.load %arg4[%c0_6, %c0_7] : memref<128x128xbf16, #tpu.memory_space<vmem>>, vector<128x128xbf16>
    %c0_8 = arith.constant 0 : index
    %c0_9 = arith.constant 0 : index
    %11 = vector.load %arg5[%c0_8, %c0_9] : memref<1x128xf32, #tpu.memory_space<vmem>>, vector<1x128xf32>
    %cst_10 = arith.constant dense<0.000000e+00> : vector<16x128xf32>
    %12 = tpu.matmul %9, %10, %cst_10 {dimension_numbers = #tpu.dot_dimension_numbers<[1], [0], [0], [1], [0, 0, 1, 1], [], []>} : vector<16x128xbf16>, vector<128x128xbf16>, vector<16x128xf32> -> vector<16x128xf32>
    %13 = vector.broadcast %11 : vector<1x128xf32> to vector<16x128xf32>
    %14 = arith.addf %12, %13 : vector<16x128xf32>
    %cst_11 = arith.constant 0.000000e+00 : f32
    %15 = vector.broadcast %cst_11 : f32 to vector<16x128xf32>
    %16 = arith.maximumf %14, %15 : vector<16x128xf32>
    %17 = arith.truncf %16 : vector<16x128xf32> to vector<16x128xbf16>
    %c0_12 = arith.constant 0 : index
    %c0_13 = arith.constant 0 : index
    %18 = vector.load %arg6[%c0_12, %c0_13] : memref<128x128xbf16, #tpu.memory_space<vmem>>, vector<128x128xbf16>
    %c0_14 = arith.constant 0 : index
    %c0_15 = arith.constant 0 : index
    %19 = vector.load %arg7[%c0_14, %c0_15] : memref<1x128xf32, #tpu.memory_space<vmem>>, vector<1x128xf32>
    %cst_16 = arith.constant dense<0.000000e+00> : vector<16x128xf32>
    %20 = tpu.matmul %17, %18, %cst_16 {dimension_numbers = #tpu.dot_dimension_numbers<[1], [0], [0], [1], [0, 0, 1, 1], [], []>} : vector<16x128xbf16>, vector<128x128xbf16>, vector<16x128xf32> -> vector<16x128xf32>
    %21 = vector.broadcast %19 : vector<1x128xf32> to vector<16x128xf32>
    %22 = arith.addf %20, %21 : vector<16x128xf32>
    %23 = math.tanh %22 : vector<16x128xf32>
    %c0_17 = arith.constant 0 : index
    %c0_18 = arith.constant 0 : index
    %24 = vector.load %arg8[%c0_17, %c0_18] : memref<16x128xf32, #tpu.memory_space<vmem>>, vector<16x128xf32>
    tpu.vector_store %arg8[%c0_17, %c0_18], %23 {strides = array<i32>} : memref<16x128xf32, #tpu.memory_space<vmem>>, vector<16x128xf32>,
    return
  }
  func.func @transform_0(%arg0: i32) -> (i32, i32) {
    %c0_i32 = arith.constant 0 : i32
    %c0_i32_0 = arith.constant 0 : i32
    return %arg0, %c0_i32 : i32, i32
  }
  func.func @transform_1(%arg0: i32) -> (i32, i32) {
    %c0_i32 = arith.constant 0 : i32
    %c0_i32_0 = arith.constant 0 : i32
    %c0_i32_1 = arith.constant 0 : i32
    return %c0_i32, %c0_i32_0 : i32, i32
  }
  func.func @transform_2(%arg0: i32) -> (i32, i32) {
    %c0_i32 = arith.constant 0 : i32
    %c0_i32_0 = arith.constant 0 : i32
    %c0_i32_1 = arith.constant 0 : i32
    return %c0_i32, %c0_i32_0 : i32, i32
  }
  func.func @transform_3(%arg0: i32) -> (i32, i32) {
    %c0_i32 = arith.constant 0 : i32
    %c0_i32_0 = arith.constant 0 : i32
    %c0_i32_1 = arith.constant 0 : i32
    return %c0_i32, %c0_i32_0 : i32, i32
  }
  func.func @transform_4(%arg0: i32) -> (i32, i32) {
    %c0_i32 = arith.constant 0 : i32
    %c0_i32_0 = arith.constant 0 : i32
    %c0_i32_1 = arith.constant 0 : i32
    return %c0_i32, %c0_i32_0 : i32, i32
  }
  func.func @transform_5(%arg0: i32) -> (i32, i32) {
    %c0_i32 = arith.constant 0 : i32
    %c0_i32_0 = arith.constant 0 : i32
    %c0_i32_1 = arith.constant 0 : i32
    return %c0_i32, %c0_i32_0 : i32, i32
  }
  func.func @transform_6(%arg0: i32) -> (i32, i32) {
    %c0_i32 = arith.constant 0 : i32
    %c0_i32_0 = arith.constant 0 : i32
    %c0_i32_1 = arith.constant 0 : i32
    return %c0_i32, %c0_i32_0 : i32, i32
  }
  func.func @transform_7(%arg0: i32) -> (i32, i32) {
    %c0_i32 = arith.constant 0 : i32
    %c0_i32_0 = arith.constant 0 : i32
    return %arg0, %c0_i32 : i32, i32
  }
}

</mosaic_0001>

<bundles_post_ra>
// kernel: tpu_custom_call.1
= control target key start
LH: loop header
LB: loop body
LE: loop exit
PB: predicated region body
PF: predicated region fallthrough
CT: control target
= control target key end

     0   :  { %12 = vsyncpa [#allocation3], 0  ;;  %s832_s0 = inlined_call_operand.hbm [shape: f32[16,128], index: 0, kind: input, shape index: {}]   ;;  %s833_s1 = inlined_call_operand.hbm [shape: bf16[128,128], index: 1, kind: input, shape index: {}]   ;;  %s834_s2 = inlined_call_operand.vmem [shape: f32[1,128], index: 2, kind: input, shape index: {}]   ;;  %s835_s3 = inlined_call_operand.hbm [shape: bf16[128,128], index: 3, kind: input, shape index: {}]   ;;  %s836_s4 = inlined_call_operand.vmem [shape: f32[1,128], index: 4, kind: input, shape index: {}]   ;;  %s837_s5 = inlined_call_operand.hbm [shape: bf16[128,128], index: 5, kind: input, shape index: {}]   ;;  %s838_s6 = inlined_call_operand.vmem [shape: f32[1,128], index: 6, kind: input, shape index: {}]   ;;  %s839_s7 = inlined_call_operand.hbm [shape: f32[16,128], index: 7, kind: output, shape index: {}]  }
   0x1   :  { %13 = vsyncpa [#allocation6], 0 }
   0x2   :  { %14 = vsyncpa [#allocation9], 0 }
   0x3   :  { %15 = vsyncpa [#allocation4], 0  ;;  %s712_s24 = smov [#allocation5]  }
   0x4   :  { %s33_s25 = sshll.u32 %s712_s24, 4  ;;  %s34_s25 = int_to_ptr.vmem [resolvable:$true] %s33_s25 }
   0x5   :  { %s612_s26 = scalar_lea.vmem %s34_s25, 1024  ;;  %p617_p1 = scmp.lt.s32.totalorder %s34_s25, %s34_s25 }
   0x6   :  { %p613_p0 = scmp.ne.s32.totalorder %s34_s25, %s612_s26  ;;  %p618_p2 = scmp.lt.s32.totalorder %s612_s26, %s612_s26 }
   0x8   :  { %p619_p3 = por %p618_p2, %p617_p1 }
   0xa   :  { %p620_p4 = pnand %p619_p3, %p613_p0 }
   0xc   :  { %623 = shalt.err (!%p620_p4)
}
   0xd   :  { %s713_s27 = smov 64   ;;  %s714_s28 = smov 4  }
   0xe   :  { %39 = dma.hbm_to_vmem [thread:$0]  %s833_s1, 1024, %s34_s25, [#allocation6], %s713_s27, %s713_s27, %s714_s28  }
   0xf   :  { %s715_s8 = smov [#allocation2]  }
  0x10   :  { %s21_s9 = sshll.u32 %s715_s8, 4  ;;  %s22_s9 = int_to_ptr.vmem [resolvable:$true] %s21_s9 }
  0x11   :  { %s632_s10 = scalar_lea.vmem %s22_s9, 256  ;;  %p637_p6 = scmp.lt.s32.totalorder %s22_s9, %s22_s9 }
  0x12   :  { %p633_p5 = scmp.ne.s32.totalorder %s22_s9, %s632_s10  ;;  %p638_p7 = scmp.lt.s32.totalorder %s632_s10, %s632_s10 }
  0x14   :  { %p639_p8 = por %p638_p7, %p637_p6 }
  0x16   :  { %p640_p9 = pnand %p639_p8, %p633_p5 }
  0x18   :  { %643 = shalt.err (!%p640_p9)
}
  0x19   :  { %s716_s11 = smov 128   ;;  %s717_s12 = smov 8  }
  0x1a   :  { %27 = dma.hbm_to_vmem [thread:$0]  %s832_s0, 256, %s22_s9, [#allocation3], %s716_s11, %s716_s11, %s717_s12  }
  0x1b   :  { %s718_s1 = smov [#allocation7]   ;;  %s719_s16 = smov [#allocation8]  }
  0x1c   :  { %s47_s15 = sshll.u32 %s718_s1, 4  ;;  %s61_s17 = sshll.u32 %s719_s16, 4  ;;  %s48_s15 = int_to_ptr.vmem [resolvable:$true] %s47_s15  ;;  %s62_s17 = int_to_ptr.vmem [resolvable:$true] %s61_s17 }
  0x1d   :  { %s652_s18 = scalar_lea.vmem %s48_s15, 1024  ;;  %p657_p11 = scmp.lt.s32.totalorder %s48_s15, %s48_s15 }
  0x1e   :  { %p653_p10 = scmp.ne.s32.totalorder %s48_s15, %s652_s18  ;;  %p658_p12 = scmp.lt.s32.totalorder %s652_s18, %s652_s18 }
  0x20   :  { %p659_p13 = por %p658_p12, %p657_p11 }
  0x22   :  { %p660_p0 = pnand %p659_p13, %p653_p10 }
  0x24   :  { %663 = shalt.err (!%p660_p0)
}
  0x25   :  { %53 = dma.hbm_to_vmem [thread:$0]  %s835_s3, 1024, %s48_s15, [#allocation6], %s713_s27, %s713_s27, %s714_s28  }
  0x26   :  { %s672_s0 = scalar_lea.vmem %s62_s17, 1024  ;;  %p677_p2 = scmp.lt.s32.totalorder %s62_s17, %s62_s17 }
  0x27   :  { %p673_p1 = scmp.ne.s32.totalorder %s62_s17, %s672_s0  ;;  %p678_p3 = scmp.lt.s32.totalorder %s672_s0, %s672_s0 }
  0x29   :  { %p679_p4 = por %p678_p3, %p677_p2 }
  0x2b   :  { %p680_p5 = pnand %p679_p4, %p673_p1 }
  0x2d   :  { %683 = shalt.err (!%p680_p5)
}
  0x2e   :  { %67 = dma.hbm_to_vmem [thread:$0]  %s837_s5, 1024, %s62_s17, [#allocation9], %s713_s27, %s713_s27, %s714_s28  }
  0x2f   :  { %704 = dma.done.wait [#allocation3], 256  }
  0x30   :  { %705 = vsyncadd [#allocation3], 4294967040 }
  0x31   :  { %706 = dma.done.wait [#allocation6], 2048  }
  0x32   :  { %707 = vsyncadd [#allocation6], 4294965248 }
  0x33   :  { %708 = dma.done.wait [#allocation9], 1024  }
  0x34   :  { %709 = vsyncadd [#allocation9], 4294966272  ;;  %v720_v0 = vmov 0.0   ;;  %vm721_vm0 = vmmov 0   ;;  %v576_v1 = vld [vmem:[#allocation5 + $0x38] sm:$0xff]   ;;  %v577_v2 = vld [vmem:[#allocation5 + $0x30] sm:$0xff]  }
  0x35   :  { %505 = vmatprep.subr.bf16.mxu0 %v720_v0  ;;  %521 = vmatprep.mubr.msk.bf16.mxu0 %vm721_vm0, %v720_v0  ;;  %v578_v3 = vld [vmem:[#allocation5 + $0x28] sm:$0xff]   ;;  %v584_v4 = vld [vmem:[#allocation7 + $0x38] sm:$0xff]   ;;  %v579_v5 = vld [vmem:[#allocation5 + $0x20] sm:$0xff]  }
  0x36   :  { %525 = vmatprep.subr.bf16.mxu1 %v720_v0  ;;  %541 = vmatprep.mubr.msk.bf16.mxu1 %vm721_vm0, %v720_v0  ;;  %v585_v6 = vld [vmem:[#allocation7 + $0x30] sm:$0xff]   ;;  %v580_v7 = vld [vmem:[#allocation5 + $0x18] sm:$0xff]   ;;  %v586_v8 = vld [vmem:[#allocation7 + $0x28] sm:$0xff]  }
  0x37   :  { %506 = vmatpush3.bf16.msra.mxu0 %v576_v1  ;;  %526 = vmatpush3.bf16.msra.mxu1 %v584_v4  ;;  %v581_v9 = vld [vmem:[#allocation5 + $0x10] sm:$0xff]   ;;  %v587_v10 = vld [vmem:[#allocation7 + $0x20] sm:$0xff]   ;;  %v582_v11 = vld [vmem:[#allocation5 + $0x8] sm:$0xff]  }
  0x38   :  { %507 = vmatprep.subr.bf16.mxu0 %v720_v0  ;;  %527 = vmatprep.subr.bf16.mxu1 %v720_v0  ;;  %v588_v12 = vld [vmem:[#allocation7 + $0x18] sm:$0xff]   ;;  %v583_v13 = vld [vmem:[#allocation5] sm:$0xff]   ;;  %v83_v14 = vld [vmem:[#allocation2] sm:$0xff] }
  0x39   :  { %v84_v15 = vld [vmem:[#allocation2 + $0x8] sm:$0xff]  ;;  %v589_v17 = vld [vmem:[#allocation7 + $0x10] sm:$0xff]   ;;  %v590_v18 = vld [vmem:[#allocation7 + $0x8] sm:$0xff]  }
  0x3a   :  { %v85_v16 = vpack.c.bf16 %v84_v15, %v83_v14  ;;  %v591_v19 = vld [vmem:[#allocation7] sm:$0xff]   ;;  %v592_v20 = vld [vmem:[#allocation8 + $0x38] sm:$0xff]   ;;  %v593_v21 = vld [vmem:[#allocation8 + $0x30] sm:$0xff]  }
  0x3b   :  { %508 = vmatpush3.bf16.msra.mxu0 %v577_v2  ;;  %528 = vmatpush3.bf16.msra.mxu1 %v585_v6  ;;  %v594_v22 = vld [vmem:[#allocation8 + $0x28] sm:$0xff]   ;;  %v595_v23 = vld [vmem:[#allocation8 + $0x20] sm:$0xff]   ;;  %v596_v24 = vld [vmem:[#allocation8 + $0x18] sm:$0xff]  }
  0x3c   :  { %509 = vmatprep.subr.bf16.mxu0 %v720_v0  ;;  %529 = vmatprep.subr.bf16.mxu1 %v720_v0  ;;  %v451_v25 = vld [vmem:[%s834_s2] ss:$0 sm:$0xff]  ;;  %v598_v36 = vld [vmem:[#allocation8 + $0x8] sm:$0xff]   ;;  %v599_v37 = vld [vmem:[#allocation8] sm:$0xff]  }
  0x3d   :  { %v597_v35 = vld [vmem:[#allocation8 + $0x10] sm:$0xff]  }
  0x3e   :  { %v460_v38 = vld [vmem:[%s836_s4] ss:$0 sm:$0xff]  ;;  %s722_s4 = smov [#allocation10]  }
  0x3f   :  { %510 = vmatpush3.bf16.msra.mxu0 %v578_v3  ;;  %530 = vmatpush3.bf16.msra.mxu1 %v586_v8  ;;  %v469_v48 = vld [vmem:[%s838_s6] ss:$0 sm:$0xff]  ;;  %s437_s26 = sshll.u32 %s722_s4, 4  ;;  %s438_s26 = int_to_ptr.vmem [resolvable:$true] %s437_s26 }
  0x40   :  { %511 = vmatprep.subr.bf16.mxu0 %v720_v0  ;;  %531 = vmatprep.subr.bf16.mxu1 %v720_v0  ;;  %s684_s27 = scalar_lea.vmem %s438_s26, 256  ;;  %p689_p7 = scmp.lt.s32.totalorder %s438_s26, %s438_s26 }
  0x41   :  { %p685_p6 = scmp.ne.s32.totalorder %s438_s26, %s684_s27  ;;  %p690_p8 = scmp.lt.s32.totalorder %s684_s27, %s684_s27 }
  0x43   :  { %512 = vmatpush3.bf16.msra.mxu0 %v579_v5  ;;  %532 = vmatpush3.bf16.msra.mxu1 %v587_v10  ;;  %p691_p9 = por %p690_p8, %p689_p7 }
  0x44   :  { %513 = vmatprep.subr.bf16.mxu0 %v720_v0  ;;  %533 = vmatprep.subr.bf16.mxu1 %v720_v0 }
  0x45   :  { %p692_p10 = pnand %p691_p9, %p685_p6 }
  0x47   :  { %514 = vmatpush3.bf16.msra.mxu0 %v580_v7  ;;  %534 = vmatpush3.bf16.msra.mxu1 %v588_v12 }
  0x48   :  { %515 = vmatprep.subr.bf16.mxu0 %v720_v0  ;;  %535 = vmatprep.subr.bf16.mxu1 %v720_v0 }
  0x4b   :  { %516 = vmatpush3.bf16.msra.mxu0 %v581_v9  ;;  %536 = vmatpush3.bf16.msra.mxu1 %v589_v17 }
  0x4c   :  { %517 = vmatprep.subr.bf16.mxu0 %v720_v0  ;;  %537 = vmatprep.subr.bf16.mxu1 %v720_v0 }
  0x4f   :  { %518 = vmatpush3.bf16.msra.mxu0 %v582_v11  ;;  %538 = vmatpush3.bf16.msra.mxu1 %v590_v18 }
  0x50   :  { %519 = vmatprep.subr.bf16.mxu0 %v720_v0  ;;  %539 = vmatprep.subr.bf16.mxu1 %v720_v0 }
  0x53   :  { %520 = vmatpush3.bf16.msra.mxu0 %v583_v13  ;;  %540 = vmatpush3.bf16.msra.mxu1 %v591_v19 }
  0x54   :  { %545 = vmatprep.subr.bf16.mxu0 %v720_v0 }
  0x56   :  { %522 = vmatmul.mubr.bf16.vlgmr.msra.gmra.mxu0 %v85_v16 }
  0x57   :  { %561 = vmatprep.mubr.msk.bf16.mxu0 %vm721_vm0, %v720_v0  ;;  %546 = vmatpush3.bf16.msra.mxu0 %v592_v20 }
  0x58   :  { %547 = vmatprep.subr.bf16.mxu0 %v720_v0 }
  0x5b   :  { %548 = vmatpush3.bf16.msra.mxu0 %v593_v21 }
  0x5c   :  { %549 = vmatprep.subr.bf16.mxu0 %v720_v0 }
  0x5f   :  { %550 = vmatpush3.bf16.msra.mxu0 %v594_v22 }
  0x60   :  { %551 = vmatprep.subr.bf16.mxu0 %v720_v0 }
  0x63   :  { %552 = vmatpush3.bf16.msra.mxu0 %v595_v23 }
  0x64   :  { %553 = vmatprep.subr.bf16.mxu0 %v720_v0 }
  0x67   :  { %554 = vmatpush3.bf16.msra.mxu0 %v596_v24 }
  0x68   :  { %555 = vmatprep.subr.bf16.mxu0 %v720_v0 }
  0x6b   :  { %556 = vmatpush3.bf16.msra.mxu0 %v597_v35 }
  0x6c   :  { %557 = vmatprep.subr.bf16.mxu0 %v720_v0 }
  0x6f   :  { %558 = vmatpush3.bf16.msra.mxu0 %v598_v36 }
  0x70   :  { %559 = vmatprep.subr.bf16.mxu0 %v720_v0 }
  0x73   :  { %560 = vmatpush3.bf16.msra.mxu0 %v599_v37 }
 0x116   :  { %v191_v26 = vpop.f32.mrf.mxu0 }
 0x117   :  { %v192_v28 = vadd.f32 %v451_v25, %v191_v26 }
 0x118   :  { %v523_v27 = vpop.f32.mrf.mxu0 }
 0x119   :  { %v198_v32 = vmax.f32 %v192_v28, 0.0 }
 0x11a   :  { %v194_v29 = vpop.f32.mrf.mxu0 }
 0x11b   :  { %v195_v30 = vadd.f32 %v451_v25, %v194_v29 }
 0x11c   :  { %v524_v31 = vpop.f32.mrf.mxu0 }
 0x11d   :  { %v199_v33 = vmax.f32 %v195_v30, 0.0 }
 0x11f   :  { %v200_v34 = vpack.c.bf16 %v199_v33, %v198_v32 }
 0x121   :  { %542 = vmatmul.mubr.bf16.vlgmr.msra.gmra.mxu1 %v200_v34 }
 0x1e1   :  { %v306_v39 = vpop.f32.mrf.mxu1 }
 0x1e2   :  { %v307_v41 = vadd.f32 %v460_v38, %v306_v39 }
 0x1e3   :  { %v543_v40 = vpop.f32.mrf.mxu1 }
 0x1e4   :  { %v313_v45 = vmax.f32 %v307_v41, 0.0 }
 0x1e5   :  { %v309_v42 = vpop.f32.mrf.mxu1 }
 0x1e6   :  { %v310_v43 = vadd.f32 %v460_v38, %v309_v42 }
 0x1e7   :  { %v544_v44 = vpop.f32.mrf.mxu1 }
 0x1e8   :  { %v314_v46 = vmax.f32 %v310_v43, 0.0 }
 0x1ea   :  { %v315_v47 = vpack.c.bf16 %v314_v46, %v313_v45 }
 0x1ec   :  { %562 = vmatmul.mubr.bf16.vlgmr.msra.gmra.mxu0 %v315_v47 }
 0x2ac   :  { %v421_v49 = vpop.f32.mrf.mxu0 }
 0x2ad   :  { %v422_v50 = vadd.f32 %v469_v48, %v421_v49 }
 0x2ae   :  { %v563_v51 = vpop.f32.mrf.mxu0 }
 0x2af   :  { %600 = vtanh.f32 %v422_v50 }
 0x2b0   :  { %v424_v52 = vpop.f32.mrf.mxu0 }
 0x2b1   :  { %v425_v53 = vadd.f32 %v469_v48, %v424_v52 }
 0x2b2   :  { %v564_v54 = vpop.f32.mrf.mxu0 }
 0x2b3   :  { %602 = vtanh.f32 %v425_v53 }
 0x2bc   :  { %v601_v55 = vpop.eup %600 }
 0x2bd   :  { %430 = vst [vmem:[#allocation10] sm:$0xff] %v601_v55 }
 0x2c0   :  { %v603_v56 = vpop.eup %602 }
 0x2c1   :  { %431 = vst [vmem:[#allocation10 + $0x8] sm:$0xff] %v603_v56 }
 0x2c2   :  { %695 = shalt.err (!%p692_p10)
}
 0x2c3   :  { %443 = dma.vmem_to_hbm [thread:$0]  %s438_s26, 256, %s839_s7, [#allocation4], %s716_s11, %s716_s11, %s717_s12  }
 0x2c4   :  { %710 = dma.done.wait [#allocation4], 256  }
 0x2c5   :  { %711 = vsyncadd [#allocation4], 4294967040 }
 0x2c6   :  { %447 = vsyncpa [#allocation3], 1 }
 0x2c7   :  { %448 = vsyncpa [#allocation6], 1 }
 0x2c8   :  { %449 = vsyncpa [#allocation9], 1 }
 0x2c9   :  { %450 = vsyncpa [#allocation4], 1 }

// kernel: tpu_custom_call.1
= control target key start
LH: loop header
LB: loop body
LE: loop exit
PB: predicated region body
PF: predicated region fallthrough
CT: control target
= control target key end

     0   :  { %12 = vsyncpa [#allocation3], 0  ;;  %s832_s0 = inlined_call_operand.hbm [shape: f32[16,128], index: 0, kind: input, shape index: {}]   ;;  %s833_s1 = inlined_call_operand.hbm [shape: bf16[128,128], index: 1, kind: input, shape index: {}]   ;;  %s834_s2 = inlined_call_operand.vmem [shape: f32[1,128], index: 2, kind: input, shape index: {}]   ;;  %s835_s3 = inlined_call_operand.hbm [shape: bf16[128,128], index: 3, kind: input, shape index: {}]   ;;  %s836_s4 = inlined_call_operand.vmem [shape: f32[1,128], index: 4, kind: input, shape index: {}]   ;;  %s837_s5 = inlined_call_operand.hbm [shape: bf16[128,128], index: 5, kind: input, shape index: {}]   ;;  %s838_s6 = inlined_call_operand.vmem [shape: f32[1,128], index: 6, kind: input, shape index: {}]   ;;  %s839_s7 = inlined_call_operand.hbm [shape: f32[16,128], index: 7, kind: output, shape index: {}]  }
   0x1   :  { %13 = vsyncpa [#allocation6], 0 }
   0x2   :  { %14 = vsyncpa [#allocation9], 0 }
   0x3   :  { %15 = vsyncpa [#allocation4], 0  ;;  %s712_s24 = smov [#allocation5]  }
   0x4   :  { %s33_s25 = sshll.u32 %s712_s24, 4  ;;  %s34_s25 = int_to_ptr.vmem [resolvable:$true] %s33_s25 }
   0x5   :  { %s612_s26 = scalar_lea.vmem %s34_s25, 1024  ;;  %p617_p1 = scmp.lt.s32.totalorder %s34_s25, %s34_s25 }
   0x6   :  { %p613_p0 = scmp.ne.s32.totalorder %s34_s25, %s612_s26  ;;  %p618_p2 = scmp.lt.s32.totalorder %s612_s26, %s612_s26 }
   0x8   :  { %p619_p3 = por %p618_p2, %p617_p1 }
   0xa   :  { %p620_p4 = pnand %p619_p3, %p613_p0 }
   0xc   :  { %623 = shalt.err (!%p620_p4)
}
   0xd   :  { %s713_s27 = smov 64   ;;  %s714_s28 = smov 4  }
   0xe   :  { %39 = dma.hbm_to_vmem [thread:$0]  %s833_s1, 1024, %s34_s25, [#allocation6], %s713_s27, %s713_s27, %s714_s28  }
   0xf   :  { %s715_s8 = smov [#allocation2]  }
  0x10   :  { %s21_s9 = sshll.u32 %s715_s8, 4  ;;  %s22_s9 = int_to_ptr.vmem [resolvable:$true] %s21_s9 }
  0x11   :  { %s632_s10 = scalar_lea.vmem %s22_s9, 256  ;;  %p637_p6 = scmp.lt.s32.totalorder %s22_s9, %s22_s9 }
  0x12   :  { %p633_p5 = scmp.ne.s32.totalorder %s22_s9, %s632_s10  ;;  %p638_p7 = scmp.lt.s32.totalorder %s632_s10, %s632_s10 }
  0x14   :  { %p639_p8 = por %p638_p7, %p637_p6 }
  0x16   :  { %p640_p9 = pnand %p639_p8, %p633_p5 }
  0x18   :  { %643 = shalt.err (!%p640_p9)
}
  0x19   :  { %s716_s11 = smov 128   ;;  %s717_s12 = smov 8  }
  0x1a   :  { %27 = dma.hbm_to_vmem [thread:$0]  %s832_s0, 256, %s22_s9, [#allocation3], %s716_s11, %s716_s11, %s717_s12  }
  0x1b   :  { %s718_s1 = smov [#allocation7]   ;;  %s719_s16 = smov [#allocation8]  }
  0x1c   :  { %s47_s15 = sshll.u32 %s718_s1, 4  ;;  %s61_s17 = sshll.u32 %s719_s16, 4  ;;  %s48_s15 = int_to_ptr.vmem [resolvable:$true] %s47_s15  ;;  %s62_s17 = int_to_ptr.vmem [resolvable:$true] %s61_s17 }
  0x1d   :  { %s652_s18 = scalar_lea.vmem %s48_s15, 1024  ;;  %p657_p11 = scmp.lt.s32.totalorder %s48_s15, %s48_s15 }
  0x1e   :  { %p653_p10 = scmp.ne.s32.totalorder %s48_s15, %s652_s18  ;;  %p658_p12 = scmp.lt.s32.totalorder %s652_s18, %s652_s18 }
  0x20   :  { %p659_p13 = por %p658_p12, %p657_p11 }
  0x22   :  { %p660_p0 = pnand %p659_p13, %p653_p10 }
  0x24   :  { %663 = shalt.err (!%p660_p0)
}
  0x25   :  { %53 = dma.hbm_to_vmem [thread:$0]  %s835_s3, 1024, %s48_s15, [#allocation6], %s713_s27, %s713_s27, %s714_s28  }
  0x26   :  { %s672_s0 = scalar_lea.vmem %s62_s17, 1024  ;;  %p677_p2 = scmp.lt.s32.totalorder %s62_s17, %s62_s17 }
  0x27   :  { %p673_p1 = scmp.ne.s32.totalorder %s62_s17, %s672_s0  ;;  %p678_p3 = scmp.lt.s32.totalorder %s672_s0, %s672_s0 }
  0x29   :  { %p679_p4 = por %p678_p3, %p677_p2 }
  0x2b   :  { %p680_p5 = pnand %p679_p4, %p673_p1 }
  0x2d   :  { %683 = shalt.err (!%p680_p5)
}
  0x2e   :  { %67 = dma.hbm_to_vmem [thread:$0]  %s837_s5, 1024, %s62_s17, [#allocation9], %s713_s27, %s713_s27, %s714_s28  }
  0x2f   :  { %704 = dma.done.wait [#allocation3], 256  }
  0x30   :  { %705 = vsyncadd [#allocation3], 4294967040 }
  0x31   :  { %706 = dma.done.wait [#allocation6], 2048  }
  0x32   :  { %707 = vsyncadd [#allocation6], 4294965248 }
  0x33   :  { %708 = dma.done.wait [#allocation9], 1024  }
  0x34   :  { %709 = vsyncadd [#allocation9], 4294966272  ;;  %v720_v0 = vmov 0.0   ;;  %vm721_vm0 = vmmov 0   ;;  %v576_v1 = vld [vmem:[#allocation5 + $0x38] sm:$0xff]   ;;  %v577_v2 = vld [vmem:[#allocation5 + $0x30] sm:$0xff]  }
  0x35   :  { %505 = vmatprep.subr.bf16.mxu0 %v720_v0  ;;  %521 = vmatprep.mubr.msk.bf16.mxu0 %vm721_vm0, %v720_v0  ;;  %v578_v3 = vld [vmem:[#allocation5 + $0x28] sm:$0xff]   ;;  %v584_v4 = vld [vmem:[#allocation7 + $0x38] sm:$0xff]   ;;  %v579_v5 = vld [vmem:[#allocation5 + $0x20] sm:$0xff]  }
  0x36   :  { %525 = vmatprep.subr.bf16.mxu1 %v720_v0  ;;  %541 = vmatprep.mubr.msk.bf16.mxu1 %vm721_vm0, %v720_v0  ;;  %v585_v6 = vld [vmem:[#allocation7 + $0x30] sm:$0xff]   ;;  %v580_v7 = vld [vmem:[#allocation5 + $0x18] sm:$0xff]   ;;  %v586_v8 = vld [vmem:[#allocation7 + $0x28] sm:$0xff]  }
  0x37   :  { %506 = vmatpush3.bf16.msra.mxu0 %v576_v1  ;;  %526 = vmatpush3.bf16.msra.mxu1 %v584_v4  ;;  %v581_v9 = vld [vmem:[#allocation5 + $0x10] sm:$0xff]   ;;  %v587_v10 = vld [vmem:[#allocation7 + $0x20] sm:$0xff]   ;;  %v582_v11 = vld [vmem:[#allocation5 + $0x8] sm:$0xff]  }
  0x38   :  { %507 = vmatprep.subr.bf16.mxu0 %v720_v0  ;;  %527 = vmatprep.subr.bf16.mxu1 %v720_v0  ;;  %v588_v12 = vld [vmem:[#allocation7 + $0x18] sm:$0xff]   ;;  %v583_v13 = vld [vmem:[#allocation5] sm:$0xff]   ;;  %v83_v14 = vld [vmem:[#allocation2] sm:$0xff] }
  0x39   :  { %v84_v15 = vld [vmem:[#allocation2 + $0x8] sm:$0xff]  ;;  %v589_v17 = vld [vmem:[#allocation7 + $0x10] sm:$0xff]   ;;  %v590_v18 = vld [vmem:[#allocation7 + $0x8] sm:$0xff]  }
  0x3a   :  { %v85_v16 = vpack.c.bf16 %v84_v15, %v83_v14  ;;  %v591_v19 = vld [vmem:[#allocation7] sm:$0xff]   ;;  %v592_v20 = vld [vmem:[#allocation8 + $0x38] sm:$0xff]   ;;  %v593_v21 = vld [vmem:[#allocation8 + $0x30] sm:$0xff]  }
  0x3b   :  { %508 = vmatpush3.bf16.msra.mxu0 %v577_v2  ;;  %528 = vmatpush3.bf16.msra.mxu1 %v585_v6  ;;  %v594_v22 = vld [vmem:[#allocation8 + $0x28] sm:$0xff]   ;;  %v595_v23 = vld [vmem:[#allocation8 + $0x20] sm:$0xff]   ;;  %v596_v24 = vld [vmem:[#allocation8 + $0x18] sm:$0xff]  }
  0x3c   :  { %509 = vmatprep.subr.bf16.mxu0 %v720_v0  ;;  %529 = vmatprep.subr.bf16.mxu1 %v720_v0  ;;  %v451_v25 = vld [vmem:[%s834_s2] ss:$0 sm:$0xff]  ;;  %v598_v36 = vld [vmem:[#allocation8 + $0x8] sm:$0xff]   ;;  %v599_v37 = vld [vmem:[#allocation8] sm:$0xff]  }
  0x3d   :  { %v597_v35 = vld [vmem:[#allocation8 + $0x10] sm:$0xff]  }
  0x3e   :  { %v460_v38 = vld [vmem:[%s836_s4] ss:$0 sm:$0xff]  ;;  %s722_s4 = smov [#allocation10]  }
  0x3f   :  { %510 = vmatpush3.bf16.msra.mxu0 %v578_v3  ;;  %530 = vmatpush3.bf16.msra.mxu1 %v586_v8  ;;  %v469_v48 = vld [vmem:[%s838_s6] ss:$0 sm:$0xff]  ;;  %s437_s26 = sshll.u32 %s722_s4, 4  ;;  %s438_s26 = int_to_ptr.vmem [resolvable:$true] %s437_s26 }
  0x40   :  { %511 = vmatprep.subr.bf16.mxu0 %v720_v0  ;;  %531 = vmatprep.subr.bf16.mxu1 %v720_v0  ;;  %s684_s27 = scalar_lea.vmem %s438_s26, 256  ;;  %p689_p7 = scmp.lt.s32.totalorder %s438_s26, %s438_s26 }
  0x41   :  { %p685_p6 = scmp.ne.s32.totalorder %s438_s26, %s684_s27  ;;  %p690_p8 = scmp.lt.s32.totalorder %s684_s27, %s684_s27 }
  0x43   :  { %512 = vmatpush3.bf16.msra.mxu0 %v579_v5  ;;  %532 = vmatpush3.bf16.msra.mxu1 %v587_v10  ;;  %p691_p9 = por %p690_p8, %p689_p7 }
  0x44   :  { %513 = vmatprep.subr.bf16.mxu0 %v720_v0  ;;  %533 = vmatprep.subr.bf16.mxu1 %v720_v0 }
  0x45   :  { %p692_p10 = pnand %p691_p9, %p685_p6 }
  0x47   :  { %514 = vmatpush3.bf16.msra.mxu0 %v580_v7  ;;  %534 = vmatpush3.bf16.msra.mxu1 %v588_v12 }
  0x48   :  { %515 = vmatprep.subr.bf16.mxu0 %v720_v0  ;;  %535 = vmatprep.subr.bf16.mxu1 %v720_v0 }
  0x4b   :  { %516 = vmatpush3.bf16.msra.mxu0 %v581_v9  ;;  %536 = vmatpush3.bf16.msra.mxu1 %v589_v17 }
  0x4c   :  { %517 = vmatprep.subr.bf16.mxu0 %v720_v0  ;;  %537 = vmatprep.subr.bf16.mxu1 %v720_v0 }
  0x4f   :  { %518 = vmatpush3.bf16.msra.mxu0 %v582_v11  ;;  %538 = vmatpush3.bf16.msra.mxu1 %v590_v18 }
  0x50   :  { %519 = vmatprep.subr.bf16.mxu0 %v720_v0  ;;  %539 = vmatprep.subr.bf16.mxu1 %v720_v0 }
  0x53   :  { %520 = vmatpush3.bf16.msra.mxu0 %v583_v13  ;;  %540 = vmatpush3.bf16.msra.mxu1 %v591_v19 }
  0x54   :  { %545 = vmatprep.subr.bf16.mxu0 %v720_v0 }
  0x56   :  { %522 = vmatmul.mubr.bf16.vlgmr.msra.gmra.mxu0 %v85_v16 }
  0x57   :  { %561 = vmatprep.mubr.msk.bf16.mxu0 %vm721_vm0, %v720_v0  ;;  %546 = vmatpush3.bf16.msra.mxu0 %v592_v20 }
  0x58   :  { %547 = vmatprep.subr.bf16.mxu0 %v720_v0 }
  0x5b   :  { %548 = vmatpush3.bf16.msra.mxu0 %v593_v21 }
  0x5c   :  { %549 = vmatprep.subr.bf16.mxu0 %v720_v0 }
  0x5f   :  { %550 = vmatpush3.bf16.msra.mxu0 %v594_v22 }
  0x60   :  { %551 = vmatprep.subr.bf16.mxu0 %v720_v0 }
  0x63   :  { %552 = vmatpush3.bf16.msra.mxu0 %v595_v23 }
  0x64   :  { %553 = vmatprep.subr.bf16.mxu0 %v720_v0 }
  0x67   :  { %554 = vmatpush3.bf16.msra.mxu0 %v596_v24 }
  0x68   :  { %555 = vmatprep.subr.bf16.mxu0 %v720_v0 }
  0x6b   :  { %556 = vmatpush3.bf16.msra.mxu0 %v597_v35 }
  0x6c   :  { %557 = vmatprep.subr.bf16.mxu0 %v720_v0 }
  0x6f   :  { %558 = vmatpush3.bf16.msra.mxu0 %v598_v36 }
  0x70   :  { %559 = vmatprep.subr.bf16.mxu0 %v720_v0 }
  0x73   :  { %560 = vmatpush3.bf16.msra.mxu0 %v599_v37 }
 0x116   :  { %v191_v26 = vpop.f32.mrf.mxu0 }
 0x117   :  { %v192_v28 = vadd.f32 %v451_v25, %v191_v26 }
 0x118   :  { %v523_v27 = vpop.f32.mrf.mxu0 }
 0x119   :  { %v198_v32 = vmax.f32 %v192_v28, 0.0 }
 0x11a   :  { %v194_v29 = vpop.f32.mrf.mxu0 }
 0x11b   :  { %v195_v30 = vadd.f32 %v451_v25, %v194_v29 }
 0x11c   :  { %v524_v31 = vpop.f32.mrf.mxu0 }
 0x11d   :  { %v199_v33 = vmax.f32 %v195_v30, 0.0 }
 0x11f   :  { %v200_v34 = vpack.c.bf16 %v199_v33, %v198_v32 }
 0x121   :  { %542 = vmatmul.mubr.bf16.vlgmr.msra.gmra.mxu1 %v200_v34 }
 0x1e1   :  { %v306_v39 = vpop.f32.mrf.mxu1 }
 0x1e2   :  { %v307_v41 = vadd.f32 %v460_v38, %v306_v39 }
 0x1e3   :  { %v543_v40 = vpop.f32.mrf.mxu1 }
 0x1e4   :  { %v313_v45 = vmax.f32 %v307_v41, 0.0 }
 0x1e5   :  { %v309_v42 = vpop.f32.mrf.mxu1 }
 0x1e6   :  { %v310_v43 = vadd.f32 %v460_v38, %v309_v42 }
 0x1e7   :  { %v544_v44 = vpop.f32.mrf.mxu1 }
 0x1e8   :  { %v314_v46 = vmax.f32 %v310_v43, 0.0 }
 0x1ea   :  { %v315_v47 = vpack.c.bf16 %v314_v46, %v313_v45 }
 0x1ec   :  { %562 = vmatmul.mubr.bf16.vlgmr.msra.gmra.mxu0 %v315_v47 }
 0x2ac   :  { %v421_v49 = vpop.f32.mrf.mxu0 }
 0x2ad   :  { %v422_v50 = vadd.f32 %v469_v48, %v421_v49 }
 0x2ae   :  { %v563_v51 = vpop.f32.mrf.mxu0 }
 0x2af   :  { %600 = vtanh.f32 %v422_v50 }
 0x2b0   :  { %v424_v52 = vpop.f32.mrf.mxu0 }
 0x2b1   :  { %v425_v53 = vadd.f32 %v469_v48, %v424_v52 }
 0x2b2   :  { %v564_v54 = vpop.f32.mrf.mxu0 }
 0x2b3   :  { %602 = vtanh.f32 %v425_v53 }
 0x2bc   :  { %v601_v55 = vpop.eup %600 }
 0x2bd   :  { %430 = vst [vmem:[#allocation10] sm:$0xff] %v601_v55 }
 0x2c0   :  { %v603_v56 = vpop.eup %602 }
 0x2c1   :  { %431 = vst [vmem:[#allocation10 + $0x8] sm:$0xff] %v603_v56 }
 0x2c2   :  { %695 = shalt.err (!%p692_p10)
}
 0x2c3   :  { %443 = dma.vmem_to_hbm [thread:$0]  %s438_s26, 256, %s839_s7, [#allocation4], %s716_s11, %s716_s11, %s717_s12  }
 0x2c4   :  { %710 = dma.done.wait [#allocation4], 256  }
 0x2c5   :  { %711 = vsyncadd [#allocation4], 4294967040 }
 0x2c6   :  { %447 = vsyncpa [#allocation3], 1 }
 0x2c7   :  { %448 = vsyncpa [#allocation6], 1 }
 0x2c8   :  { %449 = vsyncpa [#allocation9], 1 }
 0x2c9   :  { %450 = vsyncpa [#allocation4], 1 }

</bundles_post_ra>
